<compile_context>
chip_gen: v7x
topology: tpu7x:2x2x1
jax: 0.10.0
libtpu: 0.0.40
codegen_flags: <defaults>
</compile_context>

<pallas_src>
from functools import partial

import jax
import jax.numpy as jnp
from jax.experimental import pallas as pl
from jax.experimental.pallas import tpu as pltpu


def _residual_kernel(x_ref, shift_ref, m_ref, w2b_ref, out_ref):
    """One batch chunk per grid step.

    x_ref     : (M, W*C)         lane-dense residual input, M = nb*H rows
    shift_ref : (2*M, M)         [S_up; S_down] block-diag per-image row shifts
    m_ref     : (3*W*C, W*Cres)  fused block-Toeplitz 3x3-conv weights
    w2b_ref   : (W*Cres, W*C)    block-diagonal 1x1-conv weights
    out_ref   : (M, W*C)
    """
    M = x_ref.shape[0]

    x = x_ref[...]                                   # (M, WC)
    a = jnp.maximum(x, 0.0)                          # ReLU(x)

    # +-1 row shifts with zero halos at image boundaries, as one small matmul
    # (selection matrix: exact, and it never leaks rows across batch images).
    ud = jnp.dot(shift_ref[...], a,
                 preferred_element_type=jnp.float32).astype(a.dtype)   # (2M, WC)
    xk = jnp.concatenate([ud[:M], a, ud[M:]], axis=-1)                 # (M, 3*WC)

    # 3x3 "same" conv, all ky/kx taps fused into one matmul with K = 3*W*C.
    h = jnp.maximum(
        jnp.dot(xk, m_ref[...], preferred_element_type=jnp.float32), 0.0)  # (M, WCr)

    # 1x1 conv (block-diagonal over the lane axis) + residual add.
    y = jnp.dot(h.astype(w2b_ref.dtype), w2b_ref[...],
                preferred_element_type=jnp.float32)                    # (M, WC)
    out_ref[...] = (x.astype(jnp.float32) + y).astype(out_ref.dtype)


@partial(jax.jit, static_argnames=("compute_dtype", "batch_block"))
def residual_forward(x_nhwc, w1_oihw, w2_oihw, *,
                     compute_dtype=jnp.float32, batch_block=None):
    """NHWC entry point (keeps activations lane-dense end-to-end).

    x_nhwc : (N, H, W, C);  w1_oihw : (Cres, C, 3, 3);  w2_oihw : (C, Cres, 1, 1)
    Returns (N, H, W, C) in `compute_dtype` (bf16 recommended on v6e/v7x,
    f32 on v5e).  `batch_block` optionally splits the batch across grid steps
    (e.g. N//2 on v7x so both TensorCores get work).
    """
    N, H, W, C = x_nhwc.shape
    Cres = w1_oihw.shape[0]
    assert w1_oihw.shape == (Cres, C, 3, 3)
    assert w2_oihw.shape == (C, Cres, 1, 1), \
        "residual add requires num_hiddens == in_channels"

    cdt = compute_dtype
    WC, WCr = W * C, W * Cres
    nb = N if batch_block is None else batch_block
    assert N % nb == 0
    MB = nb * H                                   # matmul M rows per grid step

    # (N, H, W, C) -> (N*H, W*C): free reshape (contiguous), lane-dense.
    x = x_nhwc.reshape(N * H, WC).astype(cdt)

    # Fold kx taps + channels + width zero padding into block-Toeplitz
    # matrices, one per ky, fused along K:
    #   m[ky*W*C + w_in*C + ci, w_out*Cres + co] = w1[co, ci, ky, kx],
    #   with w_in = w_out + kx - 1 (zero outside [0, W)).
    w1_hwio = jnp.transpose(w1_oihw, (2, 3, 1, 0)).astype(cdt)       # (3,3,C,Cres)
    m = jnp.concatenate([
        sum(jnp.kron(jnp.eye(W, k=1 - kx, dtype=cdt), w1_hwio[ky, kx])
            for kx in range(3))
        for ky in range(3)
    ], axis=0)                                                       # (3*W*C, W*Cres)

    # 1x1 conv as a block-diagonal (W*Cres, W*C) matrix.
    # TODO(synk): pad Cres so W*Cres is a multiple of 128 if Cres stays small
    # at scale (lane-dense intermediate h).
    w2_mat = jnp.transpose(w2_oihw[:, :, 0, 0], (1, 0)).astype(cdt)  # (Cres, C)
    w2b = jnp.kron(jnp.eye(W, dtype=cdt), w2_mat)                    # (W*Cres, W*C)

    # Row-shift matrices [S_up; S_down], block-diagonal per image: row r picks
    # row r-1 / r+1 of the same image and is zero at image boundaries.
    s_up = jnp.kron(jnp.eye(nb, dtype=cdt), jnp.eye(H, k=-1, dtype=cdt))
    s_dn = jnp.kron(jnp.eye(nb, dtype=cdt), jnp.eye(H, k=1, dtype=cdt))
    shift = jnp.concatenate([s_up, s_dn], axis=0)                    # (2*MB, MB)

    out = pl.pallas_call(
        _residual_kernel,
        out_shape=jax.ShapeDtypeStruct((N * H, WC), cdt),
        grid_spec=pltpu.PrefetchScalarGridSpec(
            num_scalar_prefetch=0,
            grid=(N // nb,),
            in_specs=[
                pl.BlockSpec((MB, WC), lambda i: (i, 0)),
                # Grid-invariant weights (constant index_map) — never
                # re-fetched.  TODO(synk): single-buffer them
                # (pipeline_mode=pl.Buffered(1)) once they grow toward the
                # VMEM budget (matters on v7x's 64 MiB).
                pl.BlockSpec((2 * MB, MB), lambda i: (0, 0)),
                pl.BlockSpec((3 * WC, WCr), lambda i: (0, 0)),
                pl.BlockSpec((WCr, WC), lambda i: (0, 0)),
            ],
            out_specs=pl.BlockSpec((MB, WC), lambda i: (i, 0)),
        ),
        compiler_params=pltpu.CompilerParams(
            dimension_semantics=("parallel",),
        ),
    )(x, shift, m, w2b)

    return out.reshape(N, H, W, C)


@partial(jax.jit, static_argnames=("compute_dtype", "batch_block"))
def residual_forward_nchw(x_nchw, w1_oihw, w2_oihw, *,
                          compute_dtype=jnp.float32, batch_block=None):
    """PyTorch-layout compatibility wrapper.  Prefer residual_forward (NHWC):
    each transpose here is a full HBM read+write pass over the activation."""
    x_nhwc = jnp.transpose(x_nchw, (0, 2, 3, 1))
    out = residual_forward(x_nhwc, w1_oihw, w2_oihw,
                           compute_dtype=compute_dtype, batch_block=batch_block)
    return jnp.transpose(out, (0, 3, 1, 2))


def _reference_forward(x_nchw, w1_oihw, w2_oihw):
    """Pure-JAX reference (lax conv) for a sanity check."""
    h = jax.nn.relu(x_nchw)
    h = jax.lax.conv_general_dilated(
        h, w1_oihw, window_strides=(1, 1), padding="SAME",
        dimension_numbers=("NCHW", "OIHW", "NCHW"))
    h = jax.nn.relu(h)
    h = jax.lax.conv_general_dilated(
        h, w2_oihw, window_strides=(1, 1), padding="VALID",
        dimension_numbers=("NCHW", "OIHW", "NCHW"))
    return x_nchw + h


if __name__ == "__main__":
    # Small shapes consistent with the module: in_channels == num_hiddens = 8,
    # num_residual_hiddens = 4, batch = 2, spatial = 16 (W*C = 128 lane-dense).
    N, C, H, W = 2, 8, 16, 16
    Cres = 4

    key = jax.random.PRNGKey(0)
    kx_, k1, k2 = jax.random.split(key, 3)
    x = jax.random.normal(kx_, (N, C, H, W), dtype=jnp.float32)
    # Deterministic synthetic weights in PyTorch OIHW convention (bias=False).
    w1 = 0.1 * jax.random.normal(k1, (Cres, C, 3, 3), dtype=jnp.float32)
    w2 = 0.1 * jax.random.normal(k2, (C, Cres, 1, 1), dtype=jnp.float32)

    ref = jax.block_until_ready(_reference_forward(x, w1, w2))

    # f32 compute path (v5e default; exact check).
    out = jax.block_until_ready(residual_forward_nchw(x, w1, w2))
    assert out.shape == (N, C, H, W)
    assert jnp.allclose(out, ref, atol=1e-5, rtol=1e-5), "f32 mismatch vs reference"

    # bf16 compute path (v6e/v7x bandwidth optimization): bf16 compute AND
    # bf16 output; looser tolerance (skip connection is quantized too).
    out_bf16 = jax.block_until_ready(
        residual_forward_nchw(x, w1, w2, compute_dtype=jnp.bfloat16))
    assert out_bf16.dtype == jnp.bfloat16
    assert jnp.allclose(out_bf16.astype(jnp.float32), ref,
                        atol=5e-2, rtol=5e-2), "bf16 mismatch vs reference"

    print("KERNEL_OK")
</pallas_src>

<mosaic_0001>
module attributes {stable_mosaic.version = 11 : i64} {
  func.func @_residual_kernel(%arg0: i32, %arg1: memref<32x128xf32, #tpu.memory_space<vmem>>, %arg2: memref<64x32xf32, #tpu.memory_space<vmem>>, %arg3: memref<384x64xf32, #tpu.memory_space<vmem>>, %arg4: memref<64x128xf32, #tpu.memory_space<vmem>>, %arg5: memref<32x128xf32, #tpu.memory_space<vmem>>) attributes {dimension_semantics = [#tpu.dimension_semantics<parallel>], iteration_bounds = array<i64: 1>, scalar_prefetch = 0 : i64, scratch_operands = 0 : i64, tpu.core_type = #tpu.core_type<tc>, window_params = [{transform_indices = @transform_0, window_bounds = array<i64: 32, 128>}, {pipeline_mode = #tpu.pipeline_mode<synchronous>, transform_indices = @transform_1, window_bounds = array<i64: 64, 32>}, {pipeline_mode = #tpu.pipeline_mode<synchronous>, transform_indices = @transform_2, window_bounds = array<i64: 384, 64>}, {pipeline_mode = #tpu.pipeline_mode<synchronous>, transform_indices = @transform_3, window_bounds = array<i64: 64, 128>}, {transform_indices = @transform_4, window_bounds = array<i64: 32, 128>}]} {
    %c0 = arith.constant 0 : index
    %c0_0 = arith.constant 0 : index
    %0 = vector.load %arg1[%c0, %c0_0] : memref<32x128xf32, #tpu.memory_space<vmem>>, vector<32x128xf32>
    %cst = arith.constant 0.000000e+00 : f32
    %1 = vector.broadcast %cst : f32 to vector<32x128xf32>
    %2 = arith.maximumf %0, %1 : vector<32x128xf32>
    %c0_1 = arith.constant 0 : index
    %c0_2 = arith.constant 0 : index
    %3 = vector.load %arg2[%c0_1, %c0_2] : memref<64x32xf32, #tpu.memory_space<vmem>>, vector<64x32xf32>
    %cst_3 = arith.constant dense<0.000000e+00> : vector<64x128xf32>
    %4 = tpu.matmul %3, %2, %cst_3 {dimension_numbers = #tpu.dot_dimension_numbers<[1], [0], [0], [1], [0, 0, 1, 1], [], []>} : vector<64x32xf32>, vector<32x128xf32>, vector<64x128xf32> -> vector<64x128xf32>
    %5 = vector.extract_strided_slice %4 {offsets = [0, 0], sizes = [32, 128], strides = [1, 1]} : vector<64x128xf32> to vector<32x128xf32>
    %6 = vector.extract_strided_slice %4 {offsets = [32, 0], sizes = [32, 128], strides = [1, 1]} : vector<64x128xf32> to vector<32x128xf32>
    %7 = tpu.concatenate %5, %2, %6 in 1 : vector<32x128xf32>, vector<32x128xf32>, vector<32x128xf32> -> vector<32x384xf32>
    %c0_4 = arith.constant 0 : index
    %c0_5 = arith.constant 0 : index
    %8 = vector.load %arg3[%c0_4, %c0_5] : memref<384x64xf32, #tpu.memory_space<vmem>>, vector<384x64xf32>
    %cst_6 = arith.constant dense<0.000000e+00> : vector<32x64xf32>
    %9 = tpu.matmul %7, %8, %cst_6 {dimension_numbers = #tpu.dot_dimension_numbers<[1], [0], [0], [1], [0, 0, 1, 1], [], []>} : vector<32x384xf32>, vector<384x64xf32>, vector<32x64xf32> -> vector<32x64xf32>
    %cst_7 = arith.constant 0.000000e+00 : f32
    %10 = vector.broadcast %cst_7 : f32 to vector<32x64xf32>
    %11 = arith.maximumf %9, %10 : vector<32x64xf32>
    %c0_8 = arith.constant 0 : index
    %c0_9 = arith.constant 0 : index
    %12 = vector.load %arg4[%c0_8, %c0_9] : memref<64x128xf32, #tpu.memory_space<vmem>>, vector<64x128xf32>
    %cst_10 = arith.constant dense<0.000000e+00> : vector<32x128xf32>
    %13 = tpu.matmul %11, %12, %cst_10 {dimension_numbers = #tpu.dot_dimension_numbers<[1], [0], [0], [1], [0, 0, 1, 1], [], []>} : vector<32x64xf32>, vector<64x128xf32>, vector<32x128xf32> -> vector<32x128xf32>
    %14 = arith.addf %0, %13 : vector<32x128xf32>
    %c0_11 = arith.constant 0 : index
    %c0_12 = arith.constant 0 : index
    %15 = vector.load %arg5[%c0_11, %c0_12] : memref<32x128xf32, #tpu.memory_space<vmem>>, vector<32x128xf32>
    tpu.vector_store %arg5[%c0_11, %c0_12], %14 {strides = array<i32>} : memref<32x128xf32, #tpu.memory_space<vmem>>, vector<32x128xf32>,
    return
  }
  func.func @transform_0(%arg0: i32) -> (i32, i32) {
    %c0_i32 = arith.constant 0 : i32
    %c0_i32_0 = arith.constant 0 : i32
    return %arg0, %c0_i32 : i32, i32
  }
  func.func @transform_1(%arg0: i32) -> (i32, i32) {
    %c0_i32 = arith.constant 0 : i32
    %c0_i32_0 = arith.constant 0 : i32
    %c0_i32_1 = arith.constant 0 : i32
    return %c0_i32, %c0_i32_0 : i32, i32
  }
  func.func @transform_2(%arg0: i32) -> (i32, i32) {
    %c0_i32 = arith.constant 0 : i32
    %c0_i32_0 = arith.constant 0 : i32
    %c0_i32_1 = arith.constant 0 : i32
    return %c0_i32, %c0_i32_0 : i32, i32
  }
  func.func @transform_3(%arg0: i32) -> (i32, i32) {
    %c0_i32 = arith.constant 0 : i32
    %c0_i32_0 = arith.constant 0 : i32
    %c0_i32_1 = arith.constant 0 : i32
    return %c0_i32, %c0_i32_0 : i32, i32
  }
  func.func @transform_4(%arg0: i32) -> (i32, i32) {
    %c0_i32 = arith.constant 0 : i32
    %c0_i32_0 = arith.constant 0 : i32
    return %arg0, %c0_i32 : i32, i32
  }
}

</mosaic_0001>

<bundles_post_ra>
// kernel: residual_forward.1
= control target key start
LH: loop header
LB: loop body
LE: loop exit
PB: predicated region body
PF: predicated region fallthrough
CT: control target
= control target key end

     0   :  { %vm33_vm0 = vcmask 261120   ;;  %vm393_vm1 = vcmask 523264   ;;  %s1048_s0 = inlined_call_operand.vmem [shape: f32[32,128], index: 0, kind: input, shape index: {}]   ;;  %s1049_s1 = inlined_call_operand.vmem [shape: f32[64,32], index: 1, kind: input, shape index: {}]   ;;  %s1050_s2 = inlined_call_operand.vmem [shape: f32[384,64], index: 2, kind: input, shape index: {}]   ;;  %s1051_s3 = inlined_call_operand.vmem [shape: f32[64,128], index: 3, kind: input, shape index: {}]   ;;  %s1052_s4 = inlined_call_operand.vmem [shape: f32[32,128], index: 4, kind: output, shape index: {}]  }
   0x1   :  { %v799_v0 = vld [vmem:[%s1048_s0] sm:$0xff]  ;;  %v804_v1 = vld [vmem:[%s1048_s0 + $0x8] sm:$0xff]  ;;  %v809_v2 = vld [vmem:[%s1048_s0 + $0x10] sm:$0xff] }
   0x2   :  { %v21_v3 = vmax.f32 %v799_v0, 0.0  ;;  %v22_v4 = vmax.f32 %v804_v1, 0.0  ;;  %v816_v5 = vld [vmem:[%s1048_s0 + $0x18] sm:$0xff]  ;;  %v23_v6 = vmax.f32 %v809_v2, 0.0  ;;  %v25_v7 = vld [vmem:[%s1049_s1] sm:$0xff]  ;;  %v180_v12 = vld [vmem:[%s1050_s2 + $0x88] sm:$0xff] }
   0x3   :  { %v24_v8 = vmax.f32 %v816_v5, 0.0  ;;  %611 = vmatprep.mubr.msk.f32.mxu0 %vm33_vm0, %v25_v7  ;;  %v179_v11 = vld [vmem:[%s1050_s2 + $0x80] sm:$0xff]  ;;  %v164_v15 = vld [vmem:[%s1050_s2 + $0x8] sm:$0xff]  ;;  %v181_v16 = vld [vmem:[%s1050_s2 + $0x90] sm:$0xff] }
   0x4   :  { %v683_v9 = vpack.c.bf16 %v22_v4, %v21_v3  ;;  %275 = vmatprep.mubr.f32.mxu1 %v21_v3  ;;  %v163_v13 = vld [vmem:[%s1050_s2] sm:$0xff]  ;;  %v691_v14 = vpack.c.bf16 %v180_v12, %v179_v11  ;;  %v182_v17 = vld [vmem:[%s1050_s2 + $0x98] sm:$0xff]  ;;  %v165_v20 = vld [vmem:[%s1050_s2 + $0x10] sm:$0xff] }
   0x5   :  { %v687_v10 = vpack.c.bf16 %v24_v8, %v23_v6  ;;  %v693_v18 = vpack.c.bf16 %v164_v15, %v163_v13  ;;  %v695_v19 = vpack.c.bf16 %v182_v17, %v181_v16  ;;  %v166_v21 = vld [vmem:[%s1050_s2 + $0x18] sm:$0xff]  ;;  %v183_v22 = vld [vmem:[%s1050_s2 + $0xa0] sm:$0xff]  ;;  %v184_v23 = vld [vmem:[%s1050_s2 + $0xa8] sm:$0xff] }
   0x6   :  { %684 = vmatprep.subr.bf16.mxu0 %v683_v9  ;;  %692 = vmatprep.subr.bf16.mxu1 %v691_v14  ;;  %v26_v24 = vld [vmem:[%s1049_s1 + $0x8] sm:$0xff]  ;;  %v697_v25 = vpack.c.bf16 %v166_v21, %v165_v20  ;;  %v195_v26 = vld [vmem:[%s1050_s2 + $0x100] sm:$0xff]  ;;  %v699_v28 = vpack.c.bf16 %v184_v23, %v183_v22  ;;  %v185_v32 = vld [vmem:[%s1050_s2 + $0xb0] sm:$0xff] }
   0x7   :  { %686 = vmatpush3.bf16.msra.mxu0 %v683_v9  ;;  %694 = vmatpush3.bf16.msra.mxu1 %v693_v18  ;;  %v196_v27 = vld [vmem:[%s1050_s2 + $0x108] sm:$0xff]  ;;  %v167_v29 = vld [vmem:[%s1050_s2 + $0x20] sm:$0xff]  ;;  %v186_v33 = vld [vmem:[%s1050_s2 + $0xb8] sm:$0xff] }
   0x8   :  { %688 = vmatprep.subr.bf16.mxu0 %v687_v10  ;;  %696 = vmatprep.subr.bf16.mxu1 %v695_v19  ;;  %v168_v30 = vld [vmem:[%s1050_s2 + $0x28] sm:$0xff]  ;;  %v723_v31 = vpack.c.bf16 %v196_v27, %v195_v26  ;;  %v197_v34 = vld [vmem:[%s1050_s2 + $0x110] sm:$0xff]  ;;  %v198_v35 = vld [vmem:[%s1050_s2 + $0x118] sm:$0xff]  ;;  %v703_v41 = vpack.c.bf16 %v186_v33, %v185_v32 }
   0x9   :  { %v27_v36 = vld [vmem:[%s1049_s1 + $0x10] sm:$0xff]  ;;  %v727_v37 = vpack.c.bf16 %v198_v35, %v197_v34  ;;  %v701_v38 = vpack.c.bf16 %v168_v30, %v167_v29  ;;  %v199_v39 = vld [vmem:[%s1050_s2 + $0x120] sm:$0xff]  ;;  %v200_v40 = vld [vmem:[%s1050_s2 + $0x128] sm:$0xff] }
   0xa   :  { %v169_v42 = vld [vmem:[%s1050_s2 + $0x30] sm:$0xff]  ;;  %v170_v43 = vld [vmem:[%s1050_s2 + $0x38] sm:$0xff]  ;;  %v187_v45 = vld [vmem:[%s1050_s2 + $0xc0] sm:$0xff]  ;;  %v731_v48 = vpack.c.bf16 %v200_v40, %v199_v39 }
   0xb   :  { %690 = vmatpush3.bf16.msra.mxu0 %v687_v10  ;;  %698 = vmatpush3.bf16.msra.mxu1 %v697_v25  ;;  %v28_v44 = vld [vmem:[%s1049_s1 + $0x18] sm:$0xff]  ;;  %v188_v46 = vld [vmem:[%s1050_s2 + $0xc8] sm:$0xff]  ;;  %v29_v47 = vld [vmem:[%s1049_s1 + $0x20] sm:$0xff]  ;;  %v705_v49 = vpack.c.bf16 %v170_v43, %v169_v42 }
   0xc   :  { %724 = vmatprep.subr.bf16.mxu0 %v723_v31  ;;  %700 = vmatprep.subr.bf16.mxu1 %v699_v28  ;;  %v201_v50 = vld [vmem:[%s1050_s2 + $0x130] sm:$0xff]  ;;  %v202_v51 = vld [vmem:[%s1050_s2 + $0x138] sm:$0xff]  ;;  %v707_v52 = vpack.c.bf16 %v188_v46, %v187_v45  ;;  %v171_v53 = vld [vmem:[%s1050_s2 + $0x40] sm:$0xff] }
   0xd   :  { %v172_v54 = vld [vmem:[%s1050_s2 + $0x48] sm:$0xff]  ;;  %v189_v56 = vld [vmem:[%s1050_s2 + $0xd0] sm:$0xff]  ;;  %v190_v57 = vld [vmem:[%s1050_s2 + $0xd8] sm:$0xff]  ;;  %v735_v59 = vpack.c.bf16 %v202_v51, %v201_v50 }
   0xe   :  { %612 = vmatmul.mubr.msk.f32.vlgmr.msra.gmra.mrb[0].mxu0 %vm33_vm0, %v26_v24  ;;  %v30_v55 = vld [vmem:[%s1049_s1 + $0x28] sm:$0xff]  ;;  %v31_v58 = vld [vmem:[%s1049_s1 + $0x30] sm:$0xff]  ;;  %v709_v60 = vpack.c.bf16 %v172_v54, %v171_v53  ;;  %v203_v61 = vld [vmem:[%s1050_s2 + $0x140] sm:$0xff]  ;;  %v711_v63 = vpack.c.bf16 %v190_v57, %v189_v56 }
   0xf   :  { %614 = vmatprep.mubr.msk.f32.mxu0 %vm33_vm0, %v27_v36  ;;  %726 = vmatpush3.bf16.msra.mxu0 %v723_v31  ;;  %v204_v62 = vld [vmem:[%s1050_s2 + $0x148] sm:$0xff]  ;;  %v173_v3 = vld [vmem:[%s1050_s2 + $0x50] sm:$0xff]  ;;  %v174_v7 = vld [vmem:[%s1050_s2 + $0x58] sm:$0xff] }
  0x10   :  { %728 = vmatprep.subr.bf16.mxu0 %v727_v37  ;;  %702 = vmatpush3.bf16.msra.mxu1 %v701_v38  ;;  %v32_v9 = vld [vmem:[%s1049_s1 + $0x38] sm:$0xff]  ;;  %v191_v10 = vld [vmem:[%s1050_s2 + $0xe0] sm:$0xff]  ;;  %v192_v11 = vld [vmem:[%s1050_s2 + $0xe8] sm:$0xff]  ;;  %v739_v12 = vpack.c.bf16 %v204_v62, %v203_v61  ;;  %v713_v13 = vpack.c.bf16 %v174_v7, %v173_v3 }
  0x11   :  { %704 = vmatprep.subr.bf16.mxu1 %v703_v41  ;;  %v205_v14 = vld [vmem:[%s1050_s2 + $0x150] sm:$0xff]  ;;  %v206_v15 = vld [vmem:[%s1050_s2 + $0x158] sm:$0xff]  ;;  %v715_v16 = vpack.c.bf16 %v192_v11, %v191_v10  ;;  %v175_v17 = vld [vmem:[%s1050_s2 + $0x60] sm:$0xff] }
  0x12   :  { %615 = vmatmul.mubr.msk.f32.gmra.mrb[2].mxu0 %vm33_vm0, %v28_v44  ;;  %v176_v18 = vld [vmem:[%s1050_s2 + $0x68] sm:$0xff]  ;;  %v193_v19 = vld [vmem:[%s1050_s2 + $0xf0] sm:$0xff]  ;;  %v194_v20 = vld [vmem:[%s1050_s2 + $0xf8] sm:$0xff]  ;;  %v743_v21 = vpack.c.bf16 %v206_v15, %v205_v14 }
  0x13   :  { %617 = vmatprep.mubr.msk.f32.mxu0 %vm33_vm0, %v29_v47  ;;  %730 = vmatpush3.bf16.msra.mxu0 %v727_v37  ;;  %v717_v22 = vpack.c.bf16 %v176_v18, %v175_v17  ;;  %v719_v23 = vpack.c.bf16 %v194_v20, %v193_v19  ;;  %v177_v24 = vld [vmem:[%s1050_s2 + $0x70] sm:$0xff]  ;;  %v178_v25 = vld [vmem:[%s1050_s2 + $0x78] sm:$0xff]  ;;  %v207_v27 = vld [vmem:[%s1050_s2 + $0x160] sm:$0xff] }
  0x14   :  { %732 = vmatprep.subr.bf16.mxu0 %v731_v48  ;;  %706 = vmatpush3.bf16.msra.mxu1 %v705_v49  ;;  %v721_v26 = vpack.c.bf16 %v178_v25, %v177_v24  ;;  %v208_v28 = vld [vmem:[%s1050_s2 + $0x168] sm:$0xff]  ;;  %v209_v30 = vld [vmem:[%s1050_s2 + $0x170] sm:$0xff]  ;;  %v210_v31 = vld [vmem:[%s1050_s2 + $0x178] sm:$0xff] }
  0x15   :  { %708 = vmatprep.subr.bf16.mxu1 %v707_v52  ;;  %v747_v29 = vpack.c.bf16 %v208_v28, %v207_v27  ;;  %v751_v32 = vpack.c.bf16 %v210_v31, %v209_v30  ;;  %v385_v33 = vld [vmem:[%s1051_s3] sm:$0xff]  ;;  %v386_v34 = vld [vmem:[%s1051_s3 + $0x8] sm:$0xff]  ;;  %v391_v47 = vld [vmem:[%s1051_s3 + $0x30] sm:$0xff] }
  0x16   :  { %618 = vmatmul.mubr.msk.f32.gmra.mrb[4].mxu0 %vm33_vm0, %v30_v55  ;;  %v755_v35 = vpack.c.bf16 %v386_v34, %v385_v33  ;;  %v390_v45 = vld [vmem:[%s1051_s3 + $0x28] sm:$0xff] }
  0x17   :  { %620 = vmatprep.mubr.msk.f32.mxu0 %vm33_vm0, %v31_v58  ;;  %734 = vmatpush3.bf16.msra.mxu0 %v731_v48  ;;  %v392_v48 = vld [vmem:[%s1051_s3 + $0x38] sm:$0xff] }
  0x18   :  { %736 = vmatprep.subr.bf16.mxu0 %v735_v59  ;;  %710 = vmatpush3.bf16.msra.mxu1 %v709_v60  ;;  %v767_v49 = vpack.c.bf16 %v392_v48, %v391_v47 }
  0x19   :  { %712 = vmatprep.subr.bf16.mxu1 %v711_v63 }
  0x1a   :  { %621 = vmatmul.mubr.msk.f32.gmra.mrb[6].mxu0 %vm33_vm0, %v32_v9 }
  0x1b   :  { %738 = vmatpush3.bf16.msra.mxu0 %v735_v59 }
  0x1c   :  { %740 = vmatprep.subr.bf16.mxu0 %v739_v12  ;;  %714 = vmatpush3.bf16.msra.mxu1 %v713_v13 }
  0x1d   :  { %716 = vmatprep.subr.bf16.mxu1 %v715_v16 }
  0x1f   :  { %742 = vmatpush3.bf16.msra.mxu0 %v739_v12 }
  0x20   :  { %744 = vmatprep.subr.bf16.mxu0 %v743_v21  ;;  %718 = vmatpush3.bf16.msra.mxu1 %v717_v22 }
  0x21   :  { %720 = vmatprep.subr.bf16.mxu1 %v719_v23 }
  0x23   :  { %746 = vmatpush3.bf16.msra.mxu0 %v743_v21 }
  0x24   :  { %722 = vmatpush3.bf16.msra.mxu1 %v721_v26  ;;  %748 = vmatprep.subr.bf16.mxu0 %v747_v29 }
  0x25   :  { %756 = vmatprep.subr.bf16.mxu1 %v755_v35 }
  0x27   :  { %750 = vmatpush3.bf16.msra.mxu0 %v747_v29 }
  0x28   :  { %752 = vmatprep.subr.bf16.mxu0 %v751_v32 }
  0x2b   :  { %754 = vmatpush3.bf16.msra.mxu0 %v751_v32 }
  0xe1   :  { %v613_v36 = vpop.f32.mrb[0].mxu0 }
  0xe2   :  { %v124_v37 = vpop.f32.mrb[1].mxu0 }
  0xe3   :  { %276 = vmatmul.mubr.f32.vlgmr.msra.gmra.mrb[0].mxu1 %v124_v37 }
  0xe4   :  { %280 = vmatprep.mubr.f32.mxu1 %v22_v4  ;;  %758 = vmatpush3.bf16.msra.mxu1 %v755_v35  ;;  %v387_v4 = vld [vmem:[%s1051_s3 + $0x10] sm:$0xff] }
  0xe5   :  { %v616_v38 = vpop.f32.mrb[2].mxu0 }
  0xe6   :  { %v134_v39 = vpop.f32.mrb[3].mxu0 }
  0xe7   :  { %281 = vmatmul.mubr.f32.gmra.mrb[2].mxu1 %v613_v36 }
  0xe8   :  { %285 = vmatprep.mubr.f32.mxu1 %v23_v6  ;;  %v388_v6 = vld [vmem:[%s1051_s3 + $0x18] sm:$0xff] }
  0xe9   :  { %v619_v40 = vpop.f32.mrb[4].mxu0  ;;  %v759_v44 = vpack.c.bf16 %v388_v6, %v387_v4 }
  0xea   :  { %v144_v41 = vpop.f32.mrb[5].mxu0 }
  0xeb   :  { %286 = vmatmul.mubr.f32.gmra.mrb[4].mxu1 %v134_v39  ;;  %655 = vmatprep.mubr.f32.mxu0 %v144_v41 }
  0xec   :  { %656 = vmatmul.mubr.f32.vlgmr.msra.gmra.mrb[8].mxu0 %v619_v40  ;;  %290 = vmatprep.mubr.f32.mxu1 %v24_v8  ;;  %v389_v8 = vld [vmem:[%s1051_s3 + $0x20] sm:$0xff] }
  0xed   :  { %v622_v42 = vpop.f32.mrb[6].mxu0  ;;  %760 = vmatprep.subr.bf16.mxu1 %v759_v44  ;;  %v763_v46 = vpack.c.bf16 %v390_v45, %v389_v8 }
  0xee   :  { %v154_v43 = vpop.f32.mrb[7].mxu0  ;;  %762 = vmatpush3.bf16.msra.mxu1 %v759_v44 }
  0xef   :  { %291 = vmatmul.mubr.f32.gmra.mrb[6].mxu1 %v616_v38  ;;  %658 = vmatprep.mubr.f32.mxu0 %v154_v43 }
  0xf0   :  { %659 = vmatmul.mubr.f32.gmra.mrb[10].mxu0 %v622_v42  ;;  %764 = vmatprep.subr.bf16.mxu1 %v763_v46 }
  0xf2   :  { %766 = vmatpush3.bf16.msra.mxu1 %v763_v46 }
  0xf3   :  { %768 = vmatprep.subr.bf16.mxu1 %v767_v49 }
  0xf6   :  { %770 = vmatpush3.bf16.msra.mxu1 %v767_v49 }
 0x1b6   :  { %v559_v50 = vpop.f32.mrb[0].mxu1 }
 0x1b7   :  { %v560_v51 = vpop.f32.mrb[1].mxu1 }
 0x1b8   :  { %v561_v52 = vadd.f32 %v560_v51, %v559_v50 }
 0x1ba   :  { %v562_v53 = vpop.f32.mrb[2].mxu1 }
 0x1bb   :  { %v563_v54 = vpop.f32.mrb[3].mxu1 }
 0x1bc   :  { %v564_v55 = vadd.f32 %v563_v54, %v562_v53 }
 0x1be   :  { %v565_v56 = vpop.f32.mrb[4].mxu1 }
 0x1bf   :  { %v566_v57 = vpop.f32.mrb[5].mxu1  ;;  %v657_v58 = vpop.f32.mrb[8].mxu0 }
 0x1c0   :  { %v567_v59 = vadd.f32 %v566_v57, %v565_v56  ;;  %v368_v60 = vadd.f32 %v657_v58, %v564_v55  ;;  %v362_v61 = vpop.f32.mrb[9].mxu0 }
 0x1c1   :  { %v363_v62 = vadd.f32 %v561_v52, %v362_v61 }
 0x1c2   :  { %v568_v63 = vpop.f32.mrb[6].mxu1  ;;  %v382_v10 = vmax.f32 %v368_v60, 0.0 }
 0x1c3   :  { %v381_v3 = vmax.f32 %v363_v62, 0.0  ;;  %v569_v7 = vpop.f32.mrb[7].mxu1  ;;  %v660_v9 = vpop.f32.mrb[10].mxu0 }
 0x1c4   :  { %v570_v11 = vadd.f32 %v569_v7, %v568_v63  ;;  %v372_v12 = vpop.f32.mrb[11].mxu0 }
 0x1c5   :  { %v373_v13 = vadd.f32 %v567_v59, %v372_v12  ;;  %677 = vmatprep.mubr.msk.f32.mxu1 %vm393_vm1, %v381_v3 }
 0x1c6   :  { %v378_v14 = vadd.f32 %v660_v9, %v570_v11  ;;  %678 = vmatmul.mubr.msk.f32.vlgmr.msra.gmra.mrb[8].mxu1 %vm393_vm1, %v382_v10 }
 0x1c7   :  { %v383_v15 = vmax.f32 %v373_v13, 0.0 }
 0x1c8   :  { %v384_v16 = vmax.f32 %v378_v14, 0.0 }
 0x1c9   :  { %680 = vmatprep.mubr.msk.f32.mxu1 %vm393_vm1, %v383_v15 }
 0x1ca   :  { %681 = vmatmul.mubr.msk.f32.gmra.mrb[10].mxu1 %vm393_vm1, %v384_v16 }
 0x299   :  { %v679_v17 = vpop.f32.mrb[8].mxu1 }
 0x29a   :  { %v492_v18 = vadd.f32 %v679_v17, %v804_v1  ;;  %v472_v19 = vpop.f32.mrb[9].mxu1 }
 0x29b   :  { %v491_v20 = vadd.f32 %v472_v19, %v799_v0 }
 0x29c   :  { %496 = vst [vmem:[%s1052_s4 + $0x8] sm:$0xff] %v492_v18 }
 0x29d   :  { %495 = vst [vmem:[%s1052_s4] sm:$0xff] %v491_v20  ;;  %v682_v21 = vpop.f32.mrb[10].mxu1 }
 0x29e   :  { %v494_v22 = vadd.f32 %v682_v21, %v816_v5  ;;  %v482_v23 = vpop.f32.mrb[11].mxu1 }
 0x29f   :  { %v493_v24 = vadd.f32 %v482_v23, %v809_v2 }
 0x2a0   :  { %498 = vst [vmem:[%s1052_s4 + $0x18] sm:$0xff] %v494_v22 }
 0x2a1   :  { %497 = vst [vmem:[%s1052_s4 + $0x10] sm:$0xff] %v493_v24 }

</bundles_post_ra>
